<compile_context>
chip_gen: v7x
topology: tpu7x:2x2x1
jax: 0.10.0
libtpu: 0.0.40
codegen_flags: <defaults>
</compile_context>

<pallas_src>
import math

import jax
import jax.numpy as jnp
from jax.experimental import pallas as pl
from jax.experimental.pallas import tpu as pltpu


LN_EPS = 1e-5
# Per-step tile working-set budget.  Kept under the smallest scoped-VMEM default
# across v5e (16 MiB) / v6e (32 MiB) / v7x (32 MiB) with headroom for weights.
_TILE_VMEM_BUDGET = 10 * 1024 * 1024


def _norm(h):
    """LayerNorm statistics only (the affine part is folded into the next matmul)."""
    mu = jnp.mean(h, axis=-1, keepdims=True)
    var = jnp.mean((h - mu) ** 2, axis=-1, keepdims=True)
    return (h - mu) * jax.lax.rsqrt(var + LN_EPS)


def mlp_gpt_kernel(x_ref, w1, w2a, w2b, head_w, hid_b, head_b, o_ref):
    # NOTE: every op below is strictly row-wise, so garbage rows in the last partial
    # tile never contaminate valid rows and their OOB output writes are dropped by
    # Pallas.  If a cross-row op is ever added, re-introduce a mask under
    # @pl.when(pl.program_id(0) == pl.num_programs(0) - 1).
    mm = w1.dtype                      # bf16 (or f32) MXU operand dtype

    x = x_ref[...].astype(jnp.float32)   # f32 stream straight from HBM
    bv = hid_b[...]                      # (3, hidden) folded biases, f32
    hb = head_b[...]                     # (1, vocab)  folded head bias, f32

    # feature_norm  (affine folded into w1 / bv[0])
    h = _norm(x)

    # fc1: Linear(state_size, 64) -> ReLU -> LayerNorm(64)  (LN1 affine -> w2a)
    h = jnp.dot(h.astype(mm), w1[...], preferred_element_type=jnp.float32) + bv[0:1, :]
    h = _norm(jnp.maximum(h, 0.0))

    # fc2[0]: Linear(64, 64) -> ReLU -> LayerNorm(64)       (LN2a affine -> w2b)
    h = jnp.dot(h.astype(mm), w2a[...], preferred_element_type=jnp.float32) + bv[1:2, :]
    h = _norm(jnp.maximum(h, 0.0))

    # fc2[1]: Linear(64, 64) -> ReLU -> LayerNorm(64)       (LN2b affine -> head)
    h = jnp.dot(h.astype(mm), w2b[...], preferred_element_type=jnp.float32) + bv[2:3, :]
    h = _norm(jnp.maximum(h, 0.0))

    # head: Linear(64, vocab_size)  (original head has no bias; hb carries the
    # folded LN2b beta contribution)
    o_ref[...] = (
        jnp.dot(h.astype(mm), head_w[...], preferred_element_type=jnp.float32) + hb
    ).astype(o_ref.dtype)


def _num_parallel_cores():
    """2 TensorCores per chip on v7x (megacore grid sharding); 1 on v5e/v6e."""
    try:
        kind = jax.devices()[0].device_kind.lower()
    except Exception:
        return 2  # conservative: smaller tiles, still correct
    return 2 if "7" in kind else 1


def _pick_tile_m(n, tile_m, state_size, hidden, vocab, n_cores):
    """Row tile: multiple of 8 (f32 sublanes), VMEM-budgeted, and split into >=2
    grid steps only when the chip has 2 TensorCores (v7x)."""
    # Approximate per-row VMEM bytes: double-buffered f32 input + output tiles,
    # the in-kernel f32/bf16 working copies of x, and a few live f32 hidden copies.
    per_row = state_size * (4 * 2 + 4 + 2) + hidden * 4 * 4 + vocab * 4 * 2
    cap = max(8, _TILE_VMEM_BUDGET // per_row)
    tile_m = min(int(tile_m), cap)
    if n_cores > 1 and n > 8:
        half = ((n + 1) // 2 + 7) // 8 * 8       # ceil(n/2) rounded up to 8
        tile_m = min(tile_m, half)
    tile_m = max(8, (tile_m // 8) * 8)
    if tile_m >= 256:                            # clean MXU M-tiling when possible
        tile_m = (tile_m // 256) * 256
    return min(tile_m, ((n + 7) // 8) * 8)


def _fold_layernorms(params, mm_dtype):
    """Fold LayerNorm affines into the following Linear:
       (norm * g + b) @ W + c  ==  norm @ (g[:, None] * W) + (b @ W + c)."""
    def fold(gamma, beta, w, bias):
        w_f = (gamma.reshape(-1, 1) * w).astype(mm_dtype)
        b_f = (beta @ w + (bias if bias is not None else 0.0)).astype(jnp.float32)
        return w_f, b_f

    w1, b1 = fold(params["ln0_w"], params["ln0_b"], params["w1"], params["b1"])
    w2a, b2a = fold(params["ln1_w"], params["ln1_b"], params["w2a"], params["b2a"])
    w2b, b2b = fold(params["ln2a_w"], params["ln2a_b"], params["w2b"], params["b2b"])
    head_w, head_b = fold(params["ln2b_w"], params["ln2b_b"], params["head_w"], None)
    hid_b = jnp.concatenate([b1, b2a, b2b], axis=0)        # (3, hidden)
    return w1, w2a, w2b, head_w, hid_b, head_b


def gpt_forward(states, params, *, state_size, tile_m=2048, use_bf16_matmul=True):
    """Pallas forward pass of the GPT MLP model.

    states: any shape with trailing dim == state_size (flattened to (N, state_size)).
    Returns logits of shape (N, 1, vocab_size), matching `x.view(-1, 1, x.size(-1))`.
    """
    x = states.reshape(-1, state_size).astype(jnp.float32)   # stream f32 once
    n = x.shape[0]
    hidden = params["w1"].shape[-1]
    vocab = params["head_w"].shape[-1]

    mm_dtype = jnp.bfloat16 if use_bf16_matmul else jnp.float32
    w1, w2a, w2b, head_w, hid_b, head_b = _fold_layernorms(params, mm_dtype)
    weights = [w1, w2a, w2b, head_w, hid_b, head_b]

    n_cores = _num_parallel_cores()
    tile_m = _pick_tile_m(n, tile_m, state_size, hidden, vocab, n_cores)
    grid_m = pl.cdiv(n, tile_m)

    def full_spec(a):
        nd = a.ndim
        return pl.BlockSpec(a.shape, lambda i, _nd=nd: (0,) * _nd)

    weight_specs = [full_spec(a) for a in weights]

    # Advisory cost estimate so XLA schedules wrapper-side ops around the kernel.
    flops = 2 * n * (state_size * hidden + 2 * hidden * hidden + hidden * vocab)
    weight_bytes = sum(int(a.size) * a.dtype.itemsize for a in weights)
    bytes_accessed = n * state_size * 4 + n * vocab * 4 + weight_bytes
    cost = pl.CostEstimate(
        flops=flops, transcendentals=4 * n, bytes_accessed=bytes_accessed
    )

    out = pl.pallas_call(
        mlp_gpt_kernel,
        out_shape=jax.ShapeDtypeStruct((n, vocab), jnp.float32),
        grid_spec=pltpu.PrefetchScalarGridSpec(
            num_scalar_prefetch=0,
            grid=(grid_m,),
            in_specs=[pl.BlockSpec((tile_m, state_size), lambda i: (i, 0))]
            + weight_specs,
            out_specs=pl.BlockSpec((tile_m, vocab), lambda i: (i, 0)),
        ),
        compiler_params=pltpu.CompilerParams(
            dimension_semantics=("parallel",)
        ),
        cost_estimate=cost,
    )(x, *weights)

    return out.reshape(-1, 1, vocab)


def init_params(key, state_size, vocab_size, hidden=64):
    """Deterministic parameter init mirroring the PyTorch module's __init__."""
    gain = math.sqrt(2.0)  # nn.init.calculate_gain('relu')
    orth = jax.nn.initializers.orthogonal(scale=gain)

    k1, k2, khead = jax.random.split(key, 3)

    params = {}
    # feature_norm = LayerNorm(state_size): weight=1, bias=0
    params["ln0_w"] = jnp.ones((1, state_size), jnp.float32)
    params["ln0_b"] = jnp.zeros((1, state_size), jnp.float32)

    # fc1: Linear(state_size, 64) orthogonal(gain), bias 0; LayerNorm(64)
    params["w1"] = orth(k1, (state_size, hidden), jnp.float32)
    params["b1"] = jnp.zeros((1, hidden), jnp.float32)
    params["ln1_w"] = jnp.ones((1, hidden), jnp.float32)
    params["ln1_b"] = jnp.zeros((1, hidden), jnp.float32)

    # fc_h: Linear(64, 64) orthogonal(gain), bias 0; LayerNorm(64).
    # fc2 = get_clones(fc_h, 2) -> both layers start as identical deep copies.
    w_h = orth(k2, (hidden, hidden), jnp.float32)
    for tag in ("2a", "2b"):
        params[f"w{tag}"] = w_h
        params[f"b{tag}"] = jnp.zeros((1, hidden), jnp.float32)
        params[f"ln{tag}_w"] = jnp.ones((1, hidden), jnp.float32)
        params[f"ln{tag}_b"] = jnp.zeros((1, hidden), jnp.float32)

    # head: Linear(64, vocab_size, bias=False), default PyTorch kaiming-uniform:
    # U(-1/sqrt(fan_in), 1/sqrt(fan_in))
    bound = 1.0 / math.sqrt(hidden)
    params["head_w"] = jax.random.uniform(
        khead, (hidden, vocab_size), jnp.float32, minval=-bound, maxval=bound
    )
    return params


def gpt_forward_ref(states, params, *, state_size, use_bf16_matmul=True):
    """Pure-JAX reference (unfolded LN affines, f32 LN math, bf16 MXU operands)."""
    mm_dtype = jnp.bfloat16 if use_bf16_matmul else jnp.float32

    def ln(h, w, b):
        mu = jnp.mean(h, axis=-1, keepdims=True)
        var = jnp.mean((h - mu) ** 2, axis=-1, keepdims=True)
        return (h - mu) * jax.lax.rsqrt(var + LN_EPS) * w + b

    def mm(a, w):
        return jnp.dot(
            a.astype(mm_dtype), w.astype(mm_dtype), preferred_element_type=jnp.float32
        )

    x = states.reshape(-1, state_size).astype(jnp.float32)
    h = ln(x, params["ln0_w"], params["ln0_b"])
    h = jnp.maximum(mm(h, params["w1"]) + params["b1"], 0.0)
    h = ln(h, params["ln1_w"], params["ln1_b"])
    for tag in ("2a", "2b"):
        h = jnp.maximum(mm(h, params[f"w{tag}"]) + params[f"b{tag}"], 0.0)
        h = ln(h, params[f"ln{tag}_w"], params[f"ln{tag}_b"])
    h = mm(h, params["head_w"])
    return h.reshape(-1, 1, h.shape[-1])


if __name__ == "__main__":
    STATE_SIZE = 32
    VOCAB_SIZE = 16

    key = jax.random.PRNGKey(0)
    k_param, k_ln, k_state1, k_state2 = jax.random.split(key, 4)
    params = init_params(k_param, STATE_SIZE, VOCAB_SIZE)

    # Perturb LN affines away from (1, 0) so the wrapper-side LN-fold path is
    # genuinely exercised against the unfolded reference.
    ln_keys = jax.random.split(k_ln, 8)
    for i, name in enumerate(("ln0", "ln1", "ln2a", "ln2b")):
        shp = params[f"{name}_w"].shape
        params[f"{name}_w"] = params[f"{name}_w"] + 0.1 * jax.random.normal(
            ln_keys[2 * i], shp, jnp.float32
        )
        params[f"{name}_b"] = params[f"{name}_b"] + 0.05 * jax.random.normal(
            ln_keys[2 * i + 1], shp, jnp.float32
        )

    # Case 1: divisible row count (batch=2, seq=4 -> N=8 rows).
    states = jax.random.normal(k_state1, (2, 4, STATE_SIZE), jnp.float32)
    logits = jax.block_until_ready(gpt_forward(states, params, state_size=STATE_SIZE))
    ref = gpt_forward_ref(states, params, state_size=STATE_SIZE)
    assert logits.shape == (8, 1, VOCAB_SIZE), logits.shape
    assert jnp.allclose(logits, ref, atol=2e-2, rtol=2e-2), "mismatch vs reference (N=8)"

    # Case 2: non-divisible row count (batch=3, seq=7 -> N=21 rows) exercises the
    # partial last tile (no mask; row-wise ops + dropped OOB output writes).
    states2 = jax.random.normal(k_state2, (3, 7, STATE_SIZE), jnp.float32)
    logits2 = jax.block_until_ready(gpt_forward(states2, params, state_size=STATE_SIZE))
    ref2 = gpt_forward_ref(states2, params, state_size=STATE_SIZE)
    assert logits2.shape == (21, 1, VOCAB_SIZE), logits2.shape
    assert jnp.allclose(logits2, ref2, atol=2e-2, rtol=2e-2), "mismatch vs reference (N=21)"

    print("KERNEL_OK")
</pallas_src>

<mosaic_0001>
module attributes {stable_mosaic.version = 11 : i64} {
  func.func @mlp_gpt_kernel(%arg0: i32, %arg1: memref<8x32xf32, #tpu.memory_space<vmem>>, %arg2: memref<32x64xbf16, #tpu.memory_space<vmem>>, %arg3: memref<64x64xbf16, #tpu.memory_space<vmem>>, %arg4: memref<64x64xbf16, #tpu.memory_space<vmem>>, %arg5: memref<64x16xbf16, #tpu.memory_space<vmem>>, %arg6: memref<3x64xf32, #tpu.memory_space<vmem>>, %arg7: memref<1x16xf32, #tpu.memory_space<vmem>>, %arg8: memref<8x16xf32, #tpu.memory_space<vmem>>) attributes {dimension_semantics = [#tpu.dimension_semantics<parallel>], iteration_bounds = array<i64: 1>, scalar_prefetch = 0 : i64, scratch_operands = 0 : i64, tpu.core_type = #tpu.core_type<tc>, window_params = [{transform_indices = @transform_0, window_bounds = array<i64: 8, 32>}, {pipeline_mode = #tpu.pipeline_mode<synchronous>, transform_indices = @transform_1, window_bounds = array<i64: 32, 64>}, {pipeline_mode = #tpu.pipeline_mode<synchronous>, transform_indices = @transform_2, window_bounds = array<i64: 64, 64>}, {pipeline_mode = #tpu.pipeline_mode<synchronous>, transform_indices = @transform_3, window_bounds = array<i64: 64, 64>}, {pipeline_mode = #tpu.pipeline_mode<synchronous>, transform_indices = @transform_4, window_bounds = array<i64: 64, 16>}, {pipeline_mode = #tpu.pipeline_mode<synchronous>, transform_indices = @transform_5, window_bounds = array<i64: 3, 64>}, {pipeline_mode = #tpu.pipeline_mode<synchronous>, transform_indices = @transform_6, window_bounds = array<i64: 1, 16>}, {transform_indices = @transform_7, window_bounds = array<i64: 8, 16>}]} {
    %c0 = arith.constant 0 : index
    %c0_0 = arith.constant 0 : index
    %0 = vector.load %arg1[%c0, %c0_0] : memref<8x32xf32, #tpu.memory_space<vmem>>, vector<8x32xf32>
    %c0_1 = arith.constant 0 : index
    %c0_2 = arith.constant 0 : index
    %1 = vector.load %arg6[%c0_1, %c0_2] : memref<3x64xf32, #tpu.memory_space<vmem>>, vector<3x64xf32>
    %c0_3 = arith.constant 0 : index
    %c0_4 = arith.constant 0 : index
    %2 = vector.load %arg7[%c0_3, %c0_4] : memref<1x16xf32, #tpu.memory_space<vmem>>, vector<1x16xf32>
    %cst = arith.constant dense<0.000000e+00> : vector<8xf32>
    %3 = vector.multi_reduction <add>, %0, %cst [1] : vector<8x32xf32> to vector<8xf32>
    %4 = vector.shape_cast %3 : vector<8xf32> to vector<8x1xf32>
    %cst_5 = arith.constant 3.200000e+01 : f32
    %5 = vector.broadcast %cst_5 : f32 to vector<8x1xf32>
    %6 = arith.divf %4, %5 : vector<8x1xf32>
    %7 = vector.broadcast %6 : vector<8x1xf32> to vector<8x32xf32>
    %8 = arith.subf %0, %7 : vector<8x32xf32>
    %9 = arith.mulf %8, %8 : vector<8x32xf32>
    %cst_6 = arith.constant dense<0.000000e+00> : vector<8xf32>
    %10 = vector.multi_reduction <add>, %9, %cst_6 [1] : vector<8x32xf32> to vector<8xf32>
    %11 = vector.shape_cast %10 : vector<8xf32> to vector<8x1xf32>
    %cst_7 = arith.constant 3.200000e+01 : f32
    %12 = vector.broadcast %cst_7 : f32 to vector<8x1xf32>
    %13 = arith.divf %11, %12 : vector<8x1xf32>
    %14 = vector.broadcast %6 : vector<8x1xf32> to vector<8x32xf32>
    %15 = arith.subf %0, %14 : vector<8x32xf32>
    %cst_8 = arith.constant 9.99999974E-6 : f32
    %16 = vector.broadcast %cst_8 : f32 to vector<8x1xf32>
    %17 = arith.addf %13, %16 : vector<8x1xf32>
    %18 = math.rsqrt %17 : vector<8x1xf32>
    %19 = vector.broadcast %18 : vector<8x1xf32> to vector<8x32xf32>
    %20 = arith.mulf %15, %19 : vector<8x32xf32>
    %21 = arith.truncf %20 : vector<8x32xf32> to vector<8x32xbf16>
    %c0_9 = arith.constant 0 : index
    %c0_10 = arith.constant 0 : index
    %22 = vector.load %arg2[%c0_9, %c0_10] : memref<32x64xbf16, #tpu.memory_space<vmem>>, vector<32x64xbf16>
    %cst_11 = arith.constant dense<0.000000e+00> : vector<8x64xf32>
    %23 = tpu.matmul %21, %22, %cst_11 {dimension_numbers = #tpu.dot_dimension_numbers<[1], [0], [0], [1], [0, 0, 1, 1], [], []>} : vector<8x32xbf16>, vector<32x64xbf16>, vector<8x64xf32> -> vector<8x64xf32>
    %24 = vector.extract_strided_slice %1 {offsets = [0, 0], sizes = [1, 64], strides = [1, 1]} : vector<3x64xf32> to vector<1x64xf32>
    %25 = vector.broadcast %24 : vector<1x64xf32> to vector<8x64xf32>
    %26 = arith.addf %23, %25 : vector<8x64xf32>
    %cst_12 = arith.constant 0.000000e+00 : f32
    %27 = vector.broadcast %cst_12 : f32 to vector<8x64xf32>
    %28 = arith.maximumf %26, %27 : vector<8x64xf32>
    %cst_13 = arith.constant dense<0.000000e+00> : vector<8xf32>
    %29 = vector.multi_reduction <add>, %28, %cst_13 [1] : vector<8x64xf32> to vector<8xf32>
    %30 = vector.shape_cast %29 : vector<8xf32> to vector<8x1xf32>
    %cst_14 = arith.constant 6.400000e+01 : f32
    %31 = vector.broadcast %cst_14 : f32 to vector<8x1xf32>
    %32 = arith.divf %30, %31 : vector<8x1xf32>
    %33 = vector.broadcast %32 : vector<8x1xf32> to vector<8x64xf32>
    %34 = arith.subf %28, %33 : vector<8x64xf32>
    %35 = arith.mulf %34, %34 : vector<8x64xf32>
    %cst_15 = arith.constant dense<0.000000e+00> : vector<8xf32>
    %36 = vector.multi_reduction <add>, %35, %cst_15 [1] : vector<8x64xf32> to vector<8xf32>
    %37 = vector.shape_cast %36 : vector<8xf32> to vector<8x1xf32>
    %cst_16 = arith.constant 6.400000e+01 : f32
    %38 = vector.broadcast %cst_16 : f32 to vector<8x1xf32>
    %39 = arith.divf %37, %38 : vector<8x1xf32>
    %40 = vector.broadcast %32 : vector<8x1xf32> to vector<8x64xf32>
    %41 = arith.subf %28, %40 : vector<8x64xf32>
    %cst_17 = arith.constant 9.99999974E-6 : f32
    %42 = vector.broadcast %cst_17 : f32 to vector<8x1xf32>
    %43 = arith.addf %39, %42 : vector<8x1xf32>
    %44 = math.rsqrt %43 : vector<8x1xf32>
    %45 = vector.broadcast %44 : vector<8x1xf32> to vector<8x64xf32>
    %46 = arith.mulf %41, %45 : vector<8x64xf32>
    %47 = arith.truncf %46 : vector<8x64xf32> to vector<8x64xbf16>
    %c0_18 = arith.constant 0 : index
    %c0_19 = arith.constant 0 : index
    %48 = vector.load %arg3[%c0_18, %c0_19] : memref<64x64xbf16, #tpu.memory_space<vmem>>, vector<64x64xbf16>
    %cst_20 = arith.constant dense<0.000000e+00> : vector<8x64xf32>
    %49 = tpu.matmul %47, %48, %cst_20 {dimension_numbers = #tpu.dot_dimension_numbers<[1], [0], [0], [1], [0, 0, 1, 1], [], []>} : vector<8x64xbf16>, vector<64x64xbf16>, vector<8x64xf32> -> vector<8x64xf32>
    %50 = vector.extract_strided_slice %1 {offsets = [1, 0], sizes = [1, 64], strides = [1, 1]} : vector<3x64xf32> to vector<1x64xf32>
    %51 = vector.broadcast %50 : vector<1x64xf32> to vector<8x64xf32>
    %52 = arith.addf %49, %51 : vector<8x64xf32>
    %cst_21 = arith.constant 0.000000e+00 : f32
    %53 = vector.broadcast %cst_21 : f32 to vector<8x64xf32>
    %54 = arith.maximumf %52, %53 : vector<8x64xf32>
    %cst_22 = arith.constant dense<0.000000e+00> : vector<8xf32>
    %55 = vector.multi_reduction <add>, %54, %cst_22 [1] : vector<8x64xf32> to vector<8xf32>
    %56 = vector.shape_cast %55 : vector<8xf32> to vector<8x1xf32>
    %cst_23 = arith.constant 6.400000e+01 : f32
    %57 = vector.broadcast %cst_23 : f32 to vector<8x1xf32>
    %58 = arith.divf %56, %57 : vector<8x1xf32>
    %59 = vector.broadcast %58 : vector<8x1xf32> to vector<8x64xf32>
    %60 = arith.subf %54, %59 : vector<8x64xf32>
    %61 = arith.mulf %60, %60 : vector<8x64xf32>
    %cst_24 = arith.constant dense<0.000000e+00> : vector<8xf32>
    %62 = vector.multi_reduction <add>, %61, %cst_24 [1] : vector<8x64xf32> to vector<8xf32>
    %63 = vector.shape_cast %62 : vector<8xf32> to vector<8x1xf32>
    %cst_25 = arith.constant 6.400000e+01 : f32
    %64 = vector.broadcast %cst_25 : f32 to vector<8x1xf32>
    %65 = arith.divf %63, %64 : vector<8x1xf32>
    %66 = vector.broadcast %58 : vector<8x1xf32> to vector<8x64xf32>
    %67 = arith.subf %54, %66 : vector<8x64xf32>
    %cst_26 = arith.constant 9.99999974E-6 : f32
    %68 = vector.broadcast %cst_26 : f32 to vector<8x1xf32>
    %69 = arith.addf %65, %68 : vector<8x1xf32>
    %70 = math.rsqrt %69 : vector<8x1xf32>
    %71 = vector.broadcast %70 : vector<8x1xf32> to vector<8x64xf32>
    %72 = arith.mulf %67, %71 : vector<8x64xf32>
    %73 = arith.truncf %72 : vector<8x64xf32> to vector<8x64xbf16>
    %c0_27 = arith.constant 0 : index
    %c0_28 = arith.constant 0 : index
    %74 = vector.load %arg4[%c0_27, %c0_28] : memref<64x64xbf16, #tpu.memory_space<vmem>>, vector<64x64xbf16>
    %cst_29 = arith.constant dense<0.000000e+00> : vector<8x64xf32>
    %75 = tpu.matmul %73, %74, %cst_29 {dimension_numbers = #tpu.dot_dimension_numbers<[1], [0], [0], [1], [0, 0, 1, 1], [], []>} : vector<8x64xbf16>, vector<64x64xbf16>, vector<8x64xf32> -> vector<8x64xf32>
    %76 = vector.extract_strided_slice %1 {offsets = [2, 0], sizes = [1, 64], strides = [1, 1]} : vector<3x64xf32> to vector<1x64xf32>
    %77 = vector.broadcast %76 : vector<1x64xf32> to vector<8x64xf32>
    %78 = arith.addf %75, %77 : vector<8x64xf32>
    %cst_30 = arith.constant 0.000000e+00 : f32
    %79 = vector.broadcast %cst_30 : f32 to vector<8x64xf32>
    %80 = arith.maximumf %78, %79 : vector<8x64xf32>
    %cst_31 = arith.constant dense<0.000000e+00> : vector<8xf32>
    %81 = vector.multi_reduction <add>, %80, %cst_31 [1] : vector<8x64xf32> to vector<8xf32>
    %82 = vector.shape_cast %81 : vector<8xf32> to vector<8x1xf32>
    %cst_32 = arith.constant 6.400000e+01 : f32
    %83 = vector.broadcast %cst_32 : f32 to vector<8x1xf32>
    %84 = arith.divf %82, %83 : vector<8x1xf32>
    %85 = vector.broadcast %84 : vector<8x1xf32> to vector<8x64xf32>
    %86 = arith.subf %80, %85 : vector<8x64xf32>
    %87 = arith.mulf %86, %86 : vector<8x64xf32>
    %cst_33 = arith.constant dense<0.000000e+00> : vector<8xf32>
    %88 = vector.multi_reduction <add>, %87, %cst_33 [1] : vector<8x64xf32> to vector<8xf32>
    %89 = vector.shape_cast %88 : vector<8xf32> to vector<8x1xf32>
    %cst_34 = arith.constant 6.400000e+01 : f32
    %90 = vector.broadcast %cst_34 : f32 to vector<8x1xf32>
    %91 = arith.divf %89, %90 : vector<8x1xf32>
    %92 = vector.broadcast %84 : vector<8x1xf32> to vector<8x64xf32>
    %93 = arith.subf %80, %92 : vector<8x64xf32>
    %cst_35 = arith.constant 9.99999974E-6 : f32
    %94 = vector.broadcast %cst_35 : f32 to vector<8x1xf32>
    %95 = arith.addf %91, %94 : vector<8x1xf32>
    %96 = math.rsqrt %95 : vector<8x1xf32>
    %97 = vector.broadcast %96 : vector<8x1xf32> to vector<8x64xf32>
    %98 = arith.mulf %93, %97 : vector<8x64xf32>
    %99 = arith.truncf %98 : vector<8x64xf32> to vector<8x64xbf16>
    %c0_36 = arith.constant 0 : index
    %c0_37 = arith.constant 0 : index
    %100 = vector.load %arg5[%c0_36, %c0_37] : memref<64x16xbf16, #tpu.memory_space<vmem>>, vector<64x16xbf16>
    %cst_38 = arith.constant dense<0.000000e+00> : vector<8x16xf32>
    %101 = tpu.matmul %99, %100, %cst_38 {dimension_numbers = #tpu.dot_dimension_numbers<[1], [0], [0], [1], [0, 0, 1, 1], [], []>} : vector<8x64xbf16>, vector<64x16xbf16>, vector<8x16xf32> -> vector<8x16xf32>
    %102 = vector.broadcast %2 : vector<1x16xf32> to vector<8x16xf32>
    %103 = arith.addf %101, %102 : vector<8x16xf32>
    %c0_39 = arith.constant 0 : index
    %c0_40 = arith.constant 0 : index
    %104 = vector.load %arg8[%c0_39, %c0_40] : memref<8x16xf32, #tpu.memory_space<vmem>>, vector<8x16xf32>
    tpu.vector_store %arg8[%c0_39, %c0_40], %103 {strides = array<i32>} : memref<8x16xf32, #tpu.memory_space<vmem>>, vector<8x16xf32>,
    return
  }
  func.func @transform_0(%arg0: i32) -> (i32, i32) {
    %c0_i32 = arith.constant 0 : i32
    %c0_i32_0 = arith.constant 0 : i32
    return %arg0, %c0_i32 : i32, i32
  }
  func.func @transform_1(%arg0: i32) -> (i32, i32) {
    %c0_i32 = arith.constant 0 : i32
    %c0_i32_0 = arith.constant 0 : i32
    %c0_i32_1 = arith.constant 0 : i32
    return %c0_i32, %c0_i32_0 : i32, i32
  }
  func.func @transform_2(%arg0: i32) -> (i32, i32) {
    %c0_i32 = arith.constant 0 : i32
    %c0_i32_0 = arith.constant 0 : i32
    %c0_i32_1 = arith.constant 0 : i32
    return %c0_i32, %c0_i32_0 : i32, i32
  }
  func.func @transform_3(%arg0: i32) -> (i32, i32) {
    %c0_i32 = arith.constant 0 : i32
    %c0_i32_0 = arith.constant 0 : i32
    %c0_i32_1 = arith.constant 0 : i32
    return %c0_i32, %c0_i32_0 : i32, i32
  }
  func.func @transform_4(%arg0: i32) -> (i32, i32) {
    %c0_i32 = arith.constant 0 : i32
    %c0_i32_0 = arith.constant 0 : i32
    %c0_i32_1 = arith.constant 0 : i32
    return %c0_i32, %c0_i32_0 : i32, i32
  }
  func.func @transform_5(%arg0: i32) -> (i32, i32) {
    %c0_i32 = arith.constant 0 : i32
    %c0_i32_0 = arith.constant 0 : i32
    %c0_i32_1 = arith.constant 0 : i32
    return %c0_i32, %c0_i32_0 : i32, i32
  }
  func.func @transform_6(%arg0: i32) -> (i32, i32) {
    %c0_i32 = arith.constant 0 : i32
    %c0_i32_0 = arith.constant 0 : i32
    %c0_i32_1 = arith.constant 0 : i32
    return %c0_i32, %c0_i32_0 : i32, i32
  }
  func.func @transform_7(%arg0: i32) -> (i32, i32) {
    %c0_i32 = arith.constant 0 : i32
    %c0_i32_0 = arith.constant 0 : i32
    return %arg0, %c0_i32 : i32, i32
  }
}

</mosaic_0001>

<bundles_post_ra>
// kernel: tpu_custom_call.1
= control target key start
LH: loop header
LB: loop body
LE: loop exit
PB: predicated region body
PF: predicated region fallthrough
CT: control target
= control target key end

     0   :  { %12 = vsyncpa [#allocation3], 0  ;;  %s784_s0 = inlined_call_operand.vmem [shape: f32[8,32], index: 0, kind: input, shape index: {}]   ;;  %s785_s1 = inlined_call_operand.hbm [shape: bf16[32,64], index: 1, kind: input, shape index: {}]   ;;  %s786_s2 = inlined_call_operand.vmem [shape: bf16[64,64], index: 2, kind: input, shape index: {}]   ;;  %s787_s3 = inlined_call_operand.hbm [shape: bf16[64,64], index: 3, kind: input, shape index: {}]   ;;  %s788_s4 = inlined_call_operand.vmem [shape: bf16[64,16], index: 4, kind: input, shape index: {}]   ;;  %s789_s5 = inlined_call_operand.vmem [shape: f32[3,64], index: 5, kind: input, shape index: {}]   ;;  %s790_s6 = inlined_call_operand.vmem [shape: f32[1,16], index: 6, kind: input, shape index: {}]   ;;  %s791_s7 = inlined_call_operand.hbm [shape: f32[8,16], index: 7, kind: output, shape index: {}]  }
   0x1   :  { %13 = vsyncpa [#allocation6], 0 }
   0x2   :  { %14 = vsyncpa [#allocation4], 0  ;;  %s624_s24 = smov [#allocation2]   ;;  %s552_s28 = scalar_lea.hbm %s785_s1, 256 }
   0x3   :  { %s22_s25 = sshll.u32 %s624_s24, 4  ;;  %p553_p0 = scmp.ne.s32.totalorder %s785_s1, %s552_s28  ;;  %s23_s25 = int_to_ptr.vmem [resolvable:$true] %s22_s25 }
   0x4   :  { %p556_p1 = scmp.lt.u32.totalorder %s552_s28, %s785_s1 }
   0x6   :  { %p558_p2 = pnand %p556_p1, %p553_p0 }
   0x8   :  { %561 = shalt.err (!%p558_p2)
}
   0x9   :  { %s562_s10 = scalar_lea.vmem %s23_s25, 256  ;;  %p567_p4 = scmp.lt.s32.totalorder %s23_s25, %s23_s25 }
   0xa   :  { %p563_p3 = scmp.ne.s32.totalorder %s23_s25, %s562_s10  ;;  %p568_p5 = scmp.lt.s32.totalorder %s562_s10, %s562_s10 }
   0xc   :  { %p569_p6 = por %p568_p5, %p567_p4 }
   0xe   :  { %p570_p7 = pnand %p569_p6, %p563_p3 }
  0x10   :  { %573 = shalt.err (!%p570_p7)
}
  0x11   :  { %s625_s11 = smov 64   ;;  %s626_s12 = smov 4  }
  0x12   :  { %28 = dma.hbm_to_vmem [thread:$0]  %s785_s1, 256, %s23_s25, [#allocation3], %s625_s11, %s625_s11, %s626_s12  }
  0x13   :  { %s627_s15 = smov [#allocation5]   ;;  %s574_s19 = scalar_lea.hbm %s787_s3, 512 }
  0x14   :  { %s36_s16 = sshll.u32 %s627_s15, 4  ;;  %p575_p8 = scmp.ne.s32.totalorder %s787_s3, %s574_s19  ;;  %s37_s16 = int_to_ptr.vmem [resolvable:$true] %s36_s16 }
  0x15   :  { %p578_p9 = scmp.lt.u32.totalorder %s574_s19, %s787_s3 }
  0x17   :  { %p580_p10 = pnand %p578_p9, %p575_p8 }
  0x19   :  { %583 = shalt.err (!%p580_p10)
}
  0x1a   :  { %s584_s24 = scalar_lea.vmem %s37_s16, 512  ;;  %p589_p12 = scmp.lt.s32.totalorder %s37_s16, %s37_s16 }
  0x1b   :  { %p585_p11 = scmp.ne.s32.totalorder %s37_s16, %s584_s24  ;;  %p590_p13 = scmp.lt.s32.totalorder %s584_s24, %s584_s24 }
  0x1d   :  { %p591_p0 = por %p590_p13, %p589_p12 }
  0x1f   :  { %p592_p1 = pnand %p591_p0, %p585_p11 }
  0x21   :  { %595 = shalt.err (!%p592_p1)
}
  0x22   :  { %42 = dma.hbm_to_vmem [thread:$0]  %s787_s3, 512, %s37_s16, [#allocation6], %s625_s11, %s625_s11, %s626_s12  }
  0x23   :  { %618 = dma.done.wait [#allocation3], 256  }
  0x24   :  { %619 = vsyncadd [#allocation3], 4294967040 }
  0x25   :  { %620 = dma.done.wait [#allocation6], 512  }
  0x26   :  { %621 = vsyncadd [#allocation6], 4294966784  ;;  %vm59_vm0 = vcmask 261120   ;;  %v56_v0 = vld [vmem:[%s784_s0] sm:$0xff]  ;;  %v628_v8 = vmov 0.0   ;;  %vm629_vm1 = vmmov 0   ;;  %v79_v16 = vlaneseq }
  0x27   :  { %v60_v1 = vsel %vm59_vm0, %v56_v0, 0.0  ;;  %v530_v7 = vld [vmem:[#allocation2] sm:$0xff]   ;;  %479 = vmatprep.subr.bf16.mxu0 %v628_v8  ;;  %483 = vmatprep.mubr.msk.bf16.mxu0 %vm629_vm1, %v628_v8  ;;  %v531_v9 = vld [vmem:[#allocation2 + $0x8] sm:$0xff]   ;;  %vm139_vm2 = vcmask 523264   ;;  %v534_v35 = vld [vmem:[%s786_s2 + $0x10] sm:$0xff]   ;;  %s630_s21 = smov [#allocation7]  }
  0x28   :  { %61 = vadd.xlane.f32.xlu0 %v60_v1  ;;  %480 = vmatpush3.bf16.msra.mxu0 %v530_v7  ;;  %v711_v17 = vshrl.u32 %v79_v16, 7  ;;  %v717_v19 = vld [vmem:[%s789_s5] sm:$0x7]  ;;  %v533_v34 = vld [vmem:[%s786_s2 + $0x8] sm:$0xff]   ;;  %v535_v36 = vld [vmem:[%s786_s2 + $0x18] sm:$0xff]   ;;  %s432_s22 = sshll.u32 %s630_s21, 4  ;;  %s433_s22 = int_to_ptr.vmem [resolvable:$true] %s432_s22 }
  0x29   :  { %487 = vmatprep.subr.bf16.mxu1 %v628_v8  ;;  %481 = vmatprep.subr.bf16.mxu0 %v628_v8  ;;  %v532_v33 = vld [vmem:[%s786_s2] sm:$0xff]   ;;  %v536_v57 = vld [vmem:[#allocation5] sm:$0xff]   ;;  %v537_v58 = vld [vmem:[#allocation5 + $0x8] sm:$0xff]   ;;  %vm424_vm3 = vcmask 130048   ;;  %p601_p3 = scmp.lt.s32.totalorder %s433_s22, %s433_s22 }
  0x2a   :  { %495 = vmatprep.mubr.msk.bf16.mxu1 %vm629_vm1, %v628_v8  ;;  %v81_v18 = vsub.s32 0, %v711_v17  ;;  %488 = vmatpush3.bf16.msra.mxu1 %v532_v33  ;;  %v165_v43 = vsub.s32 1, %v711_v17  ;;  %v538_v59 = vld [vmem:[#allocation5 + $0x10] sm:$0xff]   ;;  %v539_v60 = vld [vmem:[#allocation5 + $0x18] sm:$0xff]  }
  0x2b   :  { %489 = vmatprep.subr.bf16.mxu1 %v628_v8 }
  0x2c   :  { %482 = vmatpush3.bf16.msra.mxu0 %v531_v9  ;;  %v82_v20 = vrot.slane %v717_v19, %v81_v18  ;;  %v166_v44 = vrot.slane %v717_v19, %v165_v43 }
  0x2d   :  { %499 = vmatprep.subr.bf16.mxu0 %v628_v8 }
  0x2e   :  { %490 = vmatpush3.bf16.msra.mxu1 %v533_v34 }
  0x2f   :  { %491 = vmatprep.subr.bf16.mxu1 %v628_v8 }
  0x32   :  { %492 = vmatpush3.bf16.msra.mxu1 %v534_v35 }
  0x33   :  { %493 = vmatprep.subr.bf16.mxu1 %v628_v8 }
  0x36   :  { %494 = vmatpush3.bf16.msra.mxu1 %v535_v36 }
  0x37   :  { %511 = vmatprep.subr.bf16.mxu1 %v628_v8 }
  0xb5   :  { %v62_v2 = vpop.xlane.xlu0 %61 }
  0xb6   :  { %v64_v3 = vmul.f32 0.03125, %v62_v2 }
  0xb8   :  { %v65_v4 = vsub.f32 %v56_v0, %v64_v3  ;;  %v259_v3 = vsub.s32 2, %v711_v17  ;;  %v540_v17 = vld [vmem:[%s788_s4] sm:$0xff]  }
  0xba   :  { %v66_v5 = vmul.f32 %v65_v4, %v65_v4 }
  0xbc   :  { %v67_v6 = vsel %vm59_vm0, %v66_v5, 0.0 }
  0xbd   :  { %68 = vadd.xlane.f32.xlu0 %v67_v6 }
 0x14a   :  { %v69_v10 = vpop.xlane.xlu0 %68 }
 0x14b   :  { %v70_v11 = vmul.f32 0.03125, %v69_v10 }
 0x14d   :  { %v71_v12 = vadd.f32 1e-05, %v70_v11 }
 0x14f   :  { %544 = vrsqrt.f32 %v71_v12 }
 0x159   :  { %v545_v13 = vpop.eup %544 }
 0x15a   :  { %v73_v14 = vmul.f32 %v545_v13, %v65_v4  ;;  %v260_v4 = vrot.slane %v717_v19, %v259_v3  ;;  %v541_v19 = vld [vmem:[%s788_s4 + $0x8] sm:$0xff]  }
 0x15c   :  { %v74_v15 = vpack.c.bf16 %v73_v14, %v73_v14 }
 0x15e   :  { %484 = vmatmul.mubr.msk.bf16.vlgmr.msra.gmra.mrb[0].mxu0 %vm59_vm0, %v74_v15 }
 0x15f   :  { %507 = vmatprep.mubr.msk.bf16.mxu0 %vm629_vm1, %v628_v8  ;;  %500 = vmatpush3.bf16.msra.mxu0 %v536_v57 }
 0x160   :  { %501 = vmatprep.subr.bf16.mxu0 %v628_v8 }
 0x163   :  { %502 = vmatpush3.bf16.msra.mxu0 %v537_v58 }
 0x164   :  { %503 = vmatprep.subr.bf16.mxu0 %v628_v8 }
 0x167   :  { %504 = vmatpush3.bf16.msra.mxu0 %v538_v59 }
 0x168   :  { %505 = vmatprep.subr.bf16.mxu0 %v628_v8 }
 0x16b   :  { %506 = vmatpush3.bf16.msra.mxu0 %v539_v60 }
 0x231   :  { %v132_v21 = vpop.f32.mrb[0].mxu0 }
 0x232   :  { %v133_v22 = vadd.f32 %v132_v21, %v82_v20  ;;  %v485_v23 = vpop.f32.mrb[1].mxu0  ;;  %v542_v20 = vld [vmem:[%s788_s4 + $0x10] sm:$0xff]   ;;  %v543_v21 = vld [vmem:[%s788_s4 + $0x18] sm:$0xff]   ;;  %s596_s4 = scalar_lea.vmem %s433_s22, 128 }
 0x233   :  { %v135_v24 = vpop.f32.mrb[2].mxu0  ;;  %p597_p2 = scmp.ne.s32.totalorder %s433_s22, %s596_s4  ;;  %p602_p4 = scmp.lt.s32.totalorder %s596_s4, %s596_s4 }
 0x234   :  { %v138_v25 = vmax.f32 %v133_v22, 0.0  ;;  %v486_v26 = vpop.f32.mrb[3].mxu0 }
 0x235   :  { %p603_p5 = por %p602_p4, %p601_p3 }
 0x236   :  { %v140_v27 = vsel %vm139_vm2, %v138_v25, 0.0 }
 0x237   :  { %141 = vadd.xlane.f32.xlu1 %v140_v27  ;;  %p604_p6 = pnand %p603_p5, %p597_p2 }
 0x2c4   :  { %v142_v28 = vpop.xlane.xlu1 %141 }
 0x2c5   :  { %v144_v29 = vmul.f32 0.015625, %v142_v28  ;;  %v455_v28 = vld [vmem:[%s790_s6] ss:$0 sm:$0xff] }
 0x2c7   :  { %v145_v30 = vsub.f32 %v138_v25, %v144_v29 }
 0x2c9   :  { %v146_v31 = vmul.f32 %v145_v30, %v145_v30 }
 0x2cb   :  { %v147_v32 = vsel %vm139_vm2, %v146_v31, 0.0 }
 0x2cc   :  { %148 = vadd.xlane.f32.xlu1 %v147_v32 }
 0x359   :  { %v149_v37 = vpop.xlane.xlu1 %148 }
 0x35a   :  { %v150_v38 = vmul.f32 0.015625, %v149_v37 }
 0x35c   :  { %v151_v39 = vadd.f32 1e-05, %v150_v38 }
 0x35e   :  { %546 = vrsqrt.f32 %v151_v39 }
 0x368   :  { %v547_v40 = vpop.eup %546 }
 0x369   :  { %v153_v41 = vmul.f32 %v547_v40, %v145_v30 }
 0x36b   :  { %v154_v42 = vpack.c.bf16 %v153_v41, %v153_v41 }
 0x36d   :  { %496 = vmatmul.mubr.msk.bf16.vlgmr.msra.gmra.mrb[0].mxu1 %vm139_vm2, %v154_v42 }
 0x36e   :  { %519 = vmatprep.mubr.msk.bf16.mxu1 %vm629_vm1, %v628_v8  ;;  %512 = vmatpush3.bf16.msra.mxu1 %v540_v17 }
 0x36f   :  { %513 = vmatprep.subr.bf16.mxu1 %v628_v8 }
 0x372   :  { %514 = vmatpush3.bf16.msra.mxu1 %v541_v19 }
 0x373   :  { %515 = vmatprep.subr.bf16.mxu1 %v628_v8 }
 0x376   :  { %516 = vmatpush3.bf16.msra.mxu1 %v542_v20 }
 0x377   :  { %517 = vmatprep.subr.bf16.mxu1 %v628_v8 }
 0x37a   :  { %518 = vmatpush3.bf16.msra.mxu1 %v543_v21 }
 0x440   :  { %v228_v45 = vpop.f32.mrb[0].mxu1 }
 0x441   :  { %v229_v46 = vadd.f32 %v228_v45, %v166_v44  ;;  %v497_v47 = vpop.f32.mrb[1].mxu1 }
 0x442   :  { %v231_v48 = vpop.f32.mrb[2].mxu1 }
 0x443   :  { %v234_v49 = vmax.f32 %v229_v46, 0.0  ;;  %v498_v50 = vpop.f32.mrb[3].mxu1 }
 0x445   :  { %v235_v51 = vsel %vm139_vm2, %v234_v49, 0.0 }
 0x446   :  { %236 = vadd.xlane.f32.xlu0 %v235_v51 }
 0x4d3   :  { %v237_v52 = vpop.xlane.xlu0 %236 }
 0x4d4   :  { %v238_v53 = vmul.f32 0.015625, %v237_v52 }
 0x4d6   :  { %v239_v54 = vsub.f32 %v234_v49, %v238_v53 }
 0x4d8   :  { %v240_v55 = vmul.f32 %v239_v54, %v239_v54 }
 0x4da   :  { %v241_v56 = vsel %vm139_vm2, %v240_v55, 0.0 }
 0x4db   :  { %242 = vadd.xlane.f32.xlu1 %v241_v56 }
 0x568   :  { %v243_v61 = vpop.xlane.xlu1 %242 }
 0x569   :  { %v244_v62 = vmul.f32 0.015625, %v243_v61 }
 0x56b   :  { %v245_v63 = vadd.f32 1e-05, %v244_v62 }
 0x56d   :  { %548 = vrsqrt.f32 %v245_v63 }
 0x577   :  { %v549_v0 = vpop.eup %548 }
 0x578   :  { %v247_v1 = vmul.f32 %v549_v0, %v239_v54 }
 0x57a   :  { %v248_v2 = vpack.c.bf16 %v247_v1, %v247_v1 }
 0x57c   :  { %508 = vmatmul.mubr.msk.bf16.vlgmr.msra.gmra.mrb[4].mxu0 %vm139_vm2, %v248_v2 }
 0x64f   :  { %v322_v5 = vpop.f32.mrb[4].mxu0 }
 0x650   :  { %v323_v6 = vadd.f32 %v322_v5, %v260_v4  ;;  %v509_v7 = vpop.f32.mrb[5].mxu0 }
 0x651   :  { %v325_v9 = vpop.f32.mrb[6].mxu0 }
 0x652   :  { %v328_v10 = vmax.f32 %v323_v6, 0.0  ;;  %v510_v11 = vpop.f32.mrb[7].mxu0 }
 0x654   :  { %v329_v12 = vsel %vm139_vm2, %v328_v10, 0.0 }
 0x655   :  { %330 = vadd.xlane.f32.xlu0 %v329_v12 }
 0x6e2   :  { %v331_v13 = vpop.xlane.xlu0 %330 }
 0x6e3   :  { %v332_v14 = vmul.f32 0.015625, %v331_v13 }
 0x6e5   :  { %v333_v15 = vsub.f32 %v328_v10, %v332_v14 }
 0x6e7   :  { %v334_v16 = vmul.f32 %v333_v15, %v333_v15 }
 0x6e9   :  { %v335_v18 = vsel %vm139_vm2, %v334_v16, 0.0 }
 0x6ea   :  { %336 = vadd.xlane.f32.xlu1 %v335_v18 }
 0x777   :  { %v337_v22 = vpop.xlane.xlu1 %336 }
 0x778   :  { %v338_v23 = vmul.f32 0.015625, %v337_v22 }
 0x77a   :  { %v339_v24 = vadd.f32 1e-05, %v338_v23 }
 0x77c   :  { %550 = vrsqrt.f32 %v339_v24 }
 0x786   :  { %v551_v25 = vpop.eup %550 }
 0x787   :  { %v341_v26 = vmul.f32 %v551_v25, %v333_v15 }
 0x789   :  { %v342_v27 = vpack.c.bf16 %v341_v26, %v341_v26 }
 0x78b   :  { %520 = vmatmul.mubr.msk.bf16.vlgmr.msra.gmra.mrb[4].mxu1 %vm139_vm2, %v342_v27 }
 0x85e   :  { %v418_v8 = vpop.f32.mrb[4].mxu1 }
 0x85f   :  { %v419_v29 = vadd.f32 %v455_v28, %v418_v8  ;;  %v521_v30 = vpop.f32.mrb[5].mxu1 }
 0x860   :  { %v421_v31 = vpop.f32.mrb[6].mxu1 }
 0x861   :  { %v522_v32 = vpop.f32.mrb[7].mxu1  ;;  %425 = vst.msk [vmem:[#allocation7] sm:$0xff] %vm424_vm3, %v419_v29 }
 0x862   :  { %607 = shalt.err (!%p604_p6)
}
 0x863   :  { %s608_s6 = scalar_lea.hbm %s791_s7, 128 }
 0x864   :  { %p609_p7 = scmp.ne.s32.totalorder %s791_s7, %s608_s6  ;;  %p612_p8 = scmp.lt.u32.totalorder %s608_s6, %s791_s7 }
 0x866   :  { %p614_p9 = pnand %p612_p8, %p609_p7 }
 0x868   :  { %617 = shalt.err (!%p614_p9)
}
 0x869   :  { %435 = dma.vmem_to_hbm [thread:$0]  %s433_s22, 128, %s791_s7, [#allocation4]  }
 0x86a   :  { %622 = dma.done.wait [#allocation4], 128  }
 0x86b   :  { %623 = vsyncadd [#allocation4], 4294967168 }
 0x86c   :  { %439 = vsyncpa [#allocation3], 1 }
 0x86d   :  { %440 = vsyncpa [#allocation6], 1 }
 0x86e   :  { %441 = vsyncpa [#allocation4], 1 }

</bundles_post_ra>
